<compile_context>
chip_gen: v7x
topology: tpu7x:2x2x1
jax: 0.10.0
libtpu: 0.0.40
codegen_flags: <defaults>
</compile_context>

<pallas_src>
import math
import functools

import jax
import jax.numpy as jnp
from jax.experimental import pallas as pl
from jax.experimental.pallas import tpu as pltpu

_LANE = 128


def _round_up(x, m):
    return ((x + m - 1) // m) * m


def _vmem_capacity_bytes():
    try:
        fn = getattr(pltpu, "get_tpu_info", None)
        if fn is not None:
            cap = getattr(fn(), "vmem_capacity_bytes", None)
            if cap:
                return int(cap)
    except Exception:
        pass
    return 64 * 1024 * 1024  # conservative default: v7x per-TensorCore VMEM


def _vmem_limit_bytes():
    cap = _vmem_capacity_bytes()
    return int(min(100 * 1024 * 1024, max(32 * 1024 * 1024, (cap * 3) // 5)))


def _choose_tiles(n):
    """Return (row tile, contraction tile, padded node count)."""
    if n <= 512:
        t = _round_up(max(n, 8), 8)
        return t, t, t
    tm = 512 if _vmem_capacity_bytes() >= 96 * 1024 * 1024 else 256
    tk = 512
    return tm, tk, _round_up(n, 512)


# ----------------------------------------------------------------------------
# Linear (row-tiled):  y = x @ W + b   (+ optional fused ReLU)
# ----------------------------------------------------------------------------
def _linear_kernel(x_ref, w_ref, b_ref, o_ref, *, relu):
    y = jnp.dot(x_ref[...], w_ref[...], preferred_element_type=jnp.float32)
    y = y + b_ref[...]
    if relu:
        y = jnp.maximum(y, 0.0)
    o_ref[...] = y.astype(o_ref.dtype)


def linear(x, w, b, *, relu, tm):
    """x: (N, K), w: (K, M), b: (1, M) -> (N, M). Row-tiled, weights resident."""
    N, K = x.shape
    M = w.shape[1]
    return pl.pallas_call(
        functools.partial(_linear_kernel, relu=relu),
        out_shape=jax.ShapeDtypeStruct((N, M), jnp.float32),
        grid=(N // tm,),
        in_specs=[
            pl.BlockSpec((tm, K), lambda i: (i, 0)),
            pl.BlockSpec((K, M), lambda i: (0, 0)),
            pl.BlockSpec((1, M), lambda i: (0, 0)),
        ],
        out_specs=pl.BlockSpec((tm, M), lambda i: (i, 0)),
        compiler_params=pltpu.CompilerParams(
            dimension_semantics=("parallel",),
            vmem_limit_bytes=_vmem_limit_bytes()),
    )(x, w, b)


# ----------------------------------------------------------------------------
# MMConv: K-tiled fused multi-moment aggregation + moment attention + GCNII
# ----------------------------------------------------------------------------
def _mmconv_kernel(adj_ref, hsrc_ref, h_ref, h0_ref, w_ref, wah_ref, wam_ref,
                   o_ref, acc_ref, rs_ref, *, alpha, beta, moment,
                   use_center_moment, F):
    k = pl.program_id(1)
    nk = pl.num_programs(1)
    need_rowsum = use_center_moment and moment >= 2

    @pl.when(k == 0)
    def _init():
        acc_ref[...] = jnp.zeros_like(acc_ref)
        if need_rowsum:
            rs_ref[...] = jnp.zeros_like(rs_ref)

    # ---- streamed contraction: powers on the VPU, one bf16 MXU dot per moment ----
    adj = adj_ref[...]                                    # (TM, TK) bf16
    hs = hsrc_ref[...]                                    # (TK, F)  bf16
    p = hs
    acc_ref[:, 0:F] = acc_ref[:, 0:F] + jnp.dot(
        adj, p, preferred_element_type=jnp.float32)
    for order in range(2, moment + 1):
        p = p * hs                                        # integer powers (VPU)
        lo, hi = (order - 1) * F, order * F
        acc_ref[:, lo:hi] = acc_ref[:, lo:hi] + jnp.dot(
            adj, p, preferred_element_type=jnp.float32)
    if need_rowsum:
        rs_ref[...] = rs_ref[...] + jnp.sum(
            adj.astype(jnp.float32), axis=-1, keepdims=True)

    # ---- epilogue: moments -> attention -> GCNII residual (only at last K tile) ----
    @pl.when(k == nk - 1)
    def _epilogue():
        h = h_ref[...]                                    # (TM, F) f32
        mu = acc_ref[:, 0:F]
        if need_rowsum:
            inv_rs = pl.reciprocal(rs_ref[:, 0:1] + 1e-16, approx=True)

        def moment_val(idx):
            # Re-derived from the VMEM accumulator each use (low vreg pressure).
            if idx == 0:
                return mu
            blk = acc_ref[:, idx * F:(idx + 1) * F]
            if idx == 1:
                if need_rowsum:
                    s2 = blk - (mu * mu) * inv_rs         # S2 - S1^2/S0 (centered)
                else:
                    s2 = blk - mu * mu                    # E[x^2] - E[x]^2
                return jnp.sqrt(jnp.maximum(s2, 1e-16))
            order = idx + 1                               # signed order-th root
            sgn = jnp.sign(blk)
            return sgn * jnp.exp(jnp.log(jnp.abs(blk) + 1e-16) * (1.0 / order))

        # per-node attention over moments: VPU broadcast-mul + XLU row reduce
        logits = []
        for m_idx in range(moment):
            mval = moment_val(m_idx)
            hterm = jnp.sum(h * wah_ref[m_idx:m_idx + 1, :], axis=-1, keepdims=True)
            mterm = jnp.sum(mval * wam_ref[m_idx:m_idx + 1, :], axis=-1, keepdims=True)
            logits.append(jnp.tanh(hterm + mterm))        # (TM, 1)

        lmax = logits[0]
        for l in logits[1:]:
            lmax = jnp.maximum(lmax, l)
        exps = [jnp.exp(l - lmax) for l in logits]
        denom = exps[0]
        for e in exps[1:]:
            denom = denom + e
        inv = pl.reciprocal(denom, approx=True)           # one EUP vrcp

        agg_h = (exps[0] * inv) * moment_val(0)
        for m_idx in range(1, moment):
            agg_h = agg_h + (exps[m_idx] * inv) * moment_val(m_idx)

        # GCNII-style initial-residual + identity mapping, fused ReLU
        support = (1.0 - alpha) * agg_h + alpha * h0_ref[...]
        out = beta * jnp.dot(support, w_ref[...], preferred_element_type=jnp.float32) \
            + (1.0 - beta) * support
        o_ref[...] = jnp.maximum(out, 0.0).astype(o_ref.dtype)


def mmconv(h, h_bf16, adj_bf16, h0, conv, *, alpha, beta, tm, tk):
    N, F = h.shape
    moment = conv["moment"]
    kernel = functools.partial(
        _mmconv_kernel, alpha=alpha, beta=beta, moment=moment,
        use_center_moment=conv["use_center_moment"], F=F)

    cost = pl.CostEstimate(
        flops=int(2 * N * N * moment * F + 2 * N * F * F),
        transcendentals=int(4 * N * F * moment),
        bytes_accessed=int(N * N * 2 + (N // tm) * N * F * 2 + 6 * N * F * 4),
    )

    return pl.pallas_call(
        kernel,
        out_shape=jax.ShapeDtypeStruct((N, F), jnp.float32),
        grid=(N // tm, N // tk),
        in_specs=[
            pl.BlockSpec((tm, tk), lambda i, k: (i, k)),          # adj tile (bf16)
            pl.BlockSpec((tk, F), lambda i, k: (k, 0)),           # h source K-tile (bf16)
            pl.BlockSpec((tm, F), lambda i, k: (i, 0)),           # h dest tile (f32)
            pl.BlockSpec((tm, F), lambda i, k: (i, 0)),           # h0 dest tile
            pl.BlockSpec((F, F), lambda i, k: (0, 0)),            # conv weight
            pl.BlockSpec((moment, F), lambda i, k: (0, 0)),       # attention weight (h term)
            pl.BlockSpec((moment, F), lambda i, k: (0, 0)),       # attention weight (moment term)
        ],
        out_specs=pl.BlockSpec((tm, F), lambda i, k: (i, 0)),
        scratch_shapes=[
            pltpu.VMEM((tm, moment * F), jnp.float32),            # fused moment accumulator
            pltpu.VMEM((tm, _LANE), jnp.float32),                 # row-sum (centered path)
        ],
        compiler_params=pltpu.CompilerParams(
            dimension_semantics=("parallel", "arbitrary"),
            vmem_limit_bytes=_vmem_limit_bytes()),
        cost_estimate=cost,
    )(adj_bf16, h_bf16, h, h0, conv["weight"], conv["w_att_h"], conv["w_att_m"])


# ----------------------------------------------------------------------------
# Model wrapper (glue in plain JAX)
# ----------------------------------------------------------------------------
def mmgnn_forward(x, adj, params, *, lamda, alpha):
    # F.dropout at inference -> identity, omitted.
    N = x.shape[0]
    tm, tk, n_pad = _choose_tiles(N)
    if n_pad != N:
        x = jnp.pad(x, ((0, n_pad - N), (0, 0)))
        adj = jnp.pad(adj, ((0, n_pad - N), (0, n_pad - N)))
    adj_bf16 = adj.astype(jnp.bfloat16)   # bf16 operands, f32 MXU accumulation

    h = linear(x, params["fc_in_w"], params["fc_in_b"], relu=True, tm=tm)  # fcs[0]+ReLU
    h0 = h
    for i, conv in enumerate(params["convs"]):
        beta = math.log(lamda / (i + 1) + 1.0)
        h = mmconv(h, h.astype(jnp.bfloat16), adj_bf16, h0, conv,
                   alpha=alpha, beta=beta, tm=tm, tk=tk)
    # fcs[-1] followed (no nonlinearity) by the fresh nn.Linear(nclass, 512),
    # folded into one lane-dense (F_pad, 512) projection.
    out = linear(h, params["out_w"], params["out_b"], relu=False, tm=tm)
    return out[:N]


# ----------------------------------------------------------------------------
# Deterministic parameter init (PyTorch-style uniform bounds, lane-padded)
# ----------------------------------------------------------------------------
def init_linear(key, in_f, out_f):
    k1, k2 = jax.random.split(key)
    bound = 1.0 / math.sqrt(in_f)
    w = jax.random.uniform(k1, (in_f, out_f), jnp.float32, -bound, bound)
    b = jax.random.uniform(k2, (1, out_f), jnp.float32, -bound, bound)
    return w, b


def _pad2(a, rows, cols):
    return jnp.pad(a, ((0, rows - a.shape[0]), (0, cols - a.shape[1])))


def init_mmconv(key, nhidden, f_pad, moment, use_center_moment):
    k1, k2 = jax.random.split(key)
    stdv = 1.0 / math.sqrt(nhidden)
    w = jax.random.uniform(k1, (nhidden, nhidden), jnp.float32, -stdv, stdv)
    w_att = jax.random.uniform(k2, (2 * nhidden, moment), jnp.float32, -stdv, stdv)
    return {
        "weight": _pad2(w, f_pad, f_pad),
        "w_att_h": _pad2(w_att[:nhidden, :].T, moment, f_pad),   # (moment, F)
        "w_att_m": _pad2(w_att[nhidden:, :].T, moment, f_pad),   # (moment, F)
        "moment": moment,
        "use_center_moment": use_center_moment,
    }


def init_mmgnn_params(key, nfeat, nlayers, nhidden, nclass, moment, use_center_moment):
    f_pad = _round_up(nhidden, _LANE)      # lane-dense hidden dim
    k_fc0, k_fc1, k_fin, k_conv = jax.random.split(key, 4)
    params = {}
    w0, b0 = init_linear(k_fc0, nfeat, nhidden)
    params["fc_in_w"] = _pad2(w0, nfeat, f_pad)
    params["fc_in_b"] = _pad2(b0, 1, f_pad)
    w1, b1 = init_linear(k_fc1, nhidden, nclass)
    wf, bf = init_linear(k_fin, nclass, 512)
    params["out_w"] = _pad2(w1 @ wf, f_pad, 512)                 # folded projection
    params["out_b"] = b1 @ wf + bf
    conv_keys = jax.random.split(k_conv, nlayers)
    params["convs"] = [init_mmconv(ck, nhidden, f_pad, moment, use_center_moment)
                       for ck in conv_keys]
    return params


if __name__ == "__main__":
    # Small, forward-consistent shapes.
    N = 16
    nfeat = 16
    nhidden = 32
    nclass = 8
    nlayers = 2
    moment = 3
    lamda = 0.5
    alpha = 0.1

    key = jax.random.PRNGKey(0)
    k_x, k_adj, k_par = jax.random.split(key, 3)

    # Node features.
    x = jax.random.normal(k_x, (N, nfeat), jnp.float32)

    # Symmetric normalized adjacency with self-loops (dense stand-in for sparse adj).
    A = (jax.random.uniform(k_adj, (N, N)) < 0.3).astype(jnp.float32)
    A = jnp.maximum(A, A.T) + jnp.eye(N, dtype=jnp.float32)
    dinv = 1.0 / jnp.sqrt(A.sum(axis=1))
    adj = A * dinv[:, None] * dinv[None, :]

    # Raw (non-centered) second-moment configuration.
    params = init_mmgnn_params(k_par, nfeat, nlayers, nhidden, nclass, moment,
                               use_center_moment=False)
    out = jax.block_until_ready(mmgnn_forward(x, adj, params, lamda=lamda, alpha=alpha))
    assert out.shape == (N, 512), out.shape
    assert bool(jnp.all(jnp.isfinite(out)))

    # Centered second-moment path (single adjacency pass as well).
    params_c = init_mmgnn_params(k_par, nfeat, nlayers, nhidden, nclass, moment,
                                 use_center_moment=True)
    out_c = jax.block_until_ready(mmgnn_forward(x, adj, params_c, lamda=lamda, alpha=alpha))
    assert out_c.shape == (N, 512), out_c.shape
    assert bool(jnp.all(jnp.isfinite(out_c)))

    print("KERNEL_OK")
</pallas_src>

<mosaic_0001>
module attributes {stable_mosaic.version = 11 : i64} {
  func.func @_linear_kernel(%arg0: i32, %arg1: memref<16x16xf32, #tpu.memory_space<vmem>>, %arg2: memref<16x128xf32, #tpu.memory_space<vmem>>, %arg3: memref<1x128xf32, #tpu.memory_space<vmem>>, %arg4: memref<16x128xf32, #tpu.memory_space<vmem>>) attributes {dimension_semantics = [#tpu.dimension_semantics<parallel>], iteration_bounds = array<i64: 1>, scalar_prefetch = 0 : i64, scratch_operands = 0 : i64, tpu.core_type = #tpu.core_type<tc>, window_params = [{transform_indices = @transform_0, window_bounds = array<i64: 16, 16>}, {pipeline_mode = #tpu.pipeline_mode<synchronous>, transform_indices = @transform_1, window_bounds = array<i64: 16, 128>}, {pipeline_mode = #tpu.pipeline_mode<synchronous>, transform_indices = @transform_2, window_bounds = array<i64: 1, 128>}, {transform_indices = @transform_3, window_bounds = array<i64: 16, 128>}]} {
    %c0 = arith.constant 0 : index
    %c0_0 = arith.constant 0 : index
    %0 = vector.load %arg1[%c0, %c0_0] : memref<16x16xf32, #tpu.memory_space<vmem>>, vector<16x16xf32>
    %c0_1 = arith.constant 0 : index
    %c0_2 = arith.constant 0 : index
    %1 = vector.load %arg2[%c0_1, %c0_2] : memref<16x128xf32, #tpu.memory_space<vmem>>, vector<16x128xf32>
    %cst = arith.constant dense<0.000000e+00> : vector<16x128xf32>
    %2 = tpu.matmul %0, %1, %cst {dimension_numbers = #tpu.dot_dimension_numbers<[1], [0], [0], [1], [0, 0, 1, 1], [], []>} : vector<16x16xf32>, vector<16x128xf32>, vector<16x128xf32> -> vector<16x128xf32>
    %c0_3 = arith.constant 0 : index
    %c0_4 = arith.constant 0 : index
    %3 = vector.load %arg3[%c0_3, %c0_4] : memref<1x128xf32, #tpu.memory_space<vmem>>, vector<1x128xf32>
    %4 = vector.broadcast %3 : vector<1x128xf32> to vector<16x128xf32>
    %5 = arith.addf %2, %4 : vector<16x128xf32>
    %cst_5 = arith.constant 0.000000e+00 : f32
    %6 = vector.broadcast %cst_5 : f32 to vector<16x128xf32>
    %7 = arith.maximumf %5, %6 : vector<16x128xf32>
    %c0_6 = arith.constant 0 : index
    %c0_7 = arith.constant 0 : index
    %8 = vector.load %arg4[%c0_6, %c0_7] : memref<16x128xf32, #tpu.memory_space<vmem>>, vector<16x128xf32>
    tpu.vector_store %arg4[%c0_6, %c0_7], %7 {strides = array<i32>} : memref<16x128xf32, #tpu.memory_space<vmem>>, vector<16x128xf32>,
    return
  }
  func.func @transform_0(%arg0: i32) -> (i32, i32) {
    %c0_i32 = arith.constant 0 : i32
    %c0_i32_0 = arith.constant 0 : i32
    return %arg0, %c0_i32 : i32, i32
  }
  func.func @transform_1(%arg0: i32) -> (i32, i32) {
    %c0_i32 = arith.constant 0 : i32
    %c0_i32_0 = arith.constant 0 : i32
    %c0_i32_1 = arith.constant 0 : i32
    return %c0_i32, %c0_i32_0 : i32, i32
  }
  func.func @transform_2(%arg0: i32) -> (i32, i32) {
    %c0_i32 = arith.constant 0 : i32
    %c0_i32_0 = arith.constant 0 : i32
    %c0_i32_1 = arith.constant 0 : i32
    return %c0_i32, %c0_i32_0 : i32, i32
  }
  func.func @transform_3(%arg0: i32) -> (i32, i32) {
    %c0_i32 = arith.constant 0 : i32
    %c0_i32_0 = arith.constant 0 : i32
    return %arg0, %c0_i32 : i32, i32
  }
}

</mosaic_0001>

<bundles_post_ra>
// kernel: tpu_custom_call.1
= control target key start
LH: loop header
LB: loop body
LE: loop exit
PB: predicated region body
PF: predicated region fallthrough
CT: control target
= control target key end

     0   :  { %8 = vsyncpa [#allocation3], 0  ;;  %s326_s0 = inlined_call_operand.hbm [shape: f32[16,16], index: 0, kind: input, shape index: {}]   ;;  %s327_s1 = inlined_call_operand.hbm [shape: f32[16,128], index: 1, kind: input, shape index: {}]   ;;  %s328_s2 = inlined_call_operand.vmem [shape: f32[1,128], index: 2, kind: input, shape index: {}]   ;;  %s329_s3 = inlined_call_operand.hbm [shape: f32[16,128], index: 3, kind: output, shape index: {}]  }
   0x1   :  { %9 = vsyncpa [#allocation6], 0 }
   0x2   :  { %10 = vsyncpa [#allocation4], 0  ;;  %s253_s12 = smov [#allocation2]   ;;  %s181_s16 = scalar_lea.hbm %s326_s0, 256 }
   0x3   :  { %s16_s13 = sshll.u32 %s253_s12, 4  ;;  %p182_p0 = scmp.ne.s32.totalorder %s326_s0, %s181_s16  ;;  %s17_s13 = int_to_ptr.vmem [resolvable:$true] %s16_s13 }
   0x4   :  { %p185_p1 = scmp.lt.u32.totalorder %s181_s16, %s326_s0 }
   0x6   :  { %p187_p2 = pnand %p185_p1, %p182_p0 }
   0x8   :  { %190 = shalt.err (!%p187_p2)
}
   0x9   :  { %s191_s21 = scalar_lea.vmem %s17_s13, 256  ;;  %p196_p4 = scmp.lt.s32.totalorder %s17_s13, %s17_s13 }
   0xa   :  { %p192_p3 = scmp.ne.s32.totalorder %s17_s13, %s191_s21  ;;  %p197_p5 = scmp.lt.s32.totalorder %s191_s21, %s191_s21 }
   0xc   :  { %p198_p6 = por %p197_p5, %p196_p4 }
   0xe   :  { %p199_p7 = pnand %p198_p6, %p192_p3 }
  0x10   :  { %202 = shalt.err (!%p199_p7)
}
  0x11   :  { %s254_s22 = smov 128   ;;  %s255_s23 = smov 8  }
  0x12   :  { %22 = dma.hbm_to_vmem [thread:$0]  %s326_s0, 256, %s17_s13, [#allocation3], %s254_s22, %s254_s22, %s255_s23  }
  0x13   :  { %s256_s26 = smov [#allocation5]   ;;  %s203_s30 = scalar_lea.hbm %s327_s1, 256 }
  0x14   :  { %s28_s27 = sshll.u32 %s256_s26, 4  ;;  %p204_p8 = scmp.ne.s32.totalorder %s327_s1, %s203_s30  ;;  %s29_s27 = int_to_ptr.vmem [resolvable:$true] %s28_s27 }
  0x15   :  { %p207_p9 = scmp.lt.u32.totalorder %s203_s30, %s327_s1 }
  0x17   :  { %p209_p10 = pnand %p207_p9, %p204_p8 }
  0x19   :  { %212 = shalt.err (!%p209_p10)
}
  0x1a   :  { %s213_s8 = scalar_lea.vmem %s29_s27, 256  ;;  %p218_p12 = scmp.lt.s32.totalorder %s29_s27, %s29_s27 }
  0x1b   :  { %p214_p11 = scmp.ne.s32.totalorder %s29_s27, %s213_s8  ;;  %p219_p13 = scmp.lt.s32.totalorder %s213_s8, %s213_s8 }
  0x1d   :  { %p220_p0 = por %p219_p13, %p218_p12 }
  0x1f   :  { %p221_p1 = pnand %p220_p0, %p214_p11 }
  0x21   :  { %224 = shalt.err (!%p221_p1)
}
  0x22   :  { %34 = dma.hbm_to_vmem [thread:$0]  %s327_s1, 256, %s29_s27, [#allocation6], %s254_s22, %s254_s22, %s255_s23  }
  0x23   :  { %247 = dma.done.wait [#allocation3], 256  }
  0x24   :  { %248 = vsyncadd [#allocation3], 4294967040 }
  0x25   :  { %249 = dma.done.wait [#allocation6], 256  }
  0x26   :  { %250 = vsyncadd [#allocation6], 4294967040  ;;  %vm54_vm0 = vcmask 130048   ;;  %v45_v0 = vld [vmem:[#allocation5] sm:$0xff]  ;;  %v46_v1 = vld [vmem:[#allocation5 + $0x8] sm:$0xff]  ;;  %s257_s1 = smov [#allocation7]  }
  0x27   :  { %v43_v2 = vld [vmem:[#allocation2] sm:$0xff]  ;;  %v172_v3 = vpack.c.bf16 %v46_v1, %v45_v0  ;;  %v44_v4 = vld [vmem:[#allocation2 + $0x8] sm:$0xff]  ;;  %s145_s12 = sshll.u32 %s257_s1, 4  ;;  %s146_s12 = int_to_ptr.vmem [resolvable:$true] %s145_s12 }
  0x28   :  { %169 = vmatprep.mubr.msk.f32.mxu0 %vm54_vm0, %v43_v2  ;;  %v158_v5 = vld [vmem:[%s328_s2] ss:$0 sm:$0xff]  ;;  %s225_s13 = scalar_lea.vmem %s146_s12, 256  ;;  %p230_p3 = scmp.lt.s32.totalorder %s146_s12, %s146_s12 }
  0x29   :  { %173 = vmatprep.subr.bf16.mxu0 %v172_v3  ;;  %p226_p2 = scmp.ne.s32.totalorder %s146_s12, %s225_s13  ;;  %p231_p4 = scmp.lt.s32.totalorder %s225_s13, %s225_s13 }
  0x2a   :  { %175 = vmatpush3.bf16.msra.mxu0 %v172_v3 }
  0x2b   :  { %p232_p5 = por %p231_p4, %p230_p3 }
  0x2d   :  { %170 = vmatmul.mubr.msk.f32.vlgmr.msra.gmra.mrb[0].mxu0 %vm54_vm0, %v44_v4  ;;  %p233_p6 = pnand %p232_p5, %p226_p2 }
 0x100   :  { %v171_v6 = vpop.f32.mrb[0].mxu0 }
 0x101   :  { %v133_v7 = vadd.f32 %v171_v6, %v158_v5  ;;  %v127_v8 = vpop.f32.mrb[1].mxu0 }
 0x102   :  { %v128_v9 = vadd.f32 %v158_v5, %v127_v8 }
 0x103   :  { %v137_v10 = vmax.f32 %v133_v7, 0.0 }
 0x104   :  { %v136_v11 = vmax.f32 %v128_v9, 0.0 }
 0x105   :  { %139 = vst [vmem:[#allocation7 + $0x8] sm:$0xff] %v137_v10 }
 0x106   :  { %138 = vst [vmem:[#allocation7] sm:$0xff] %v136_v11 }
 0x107   :  { %236 = shalt.err (!%p233_p6)
}
 0x108   :  { %s237_s15 = scalar_lea.hbm %s329_s3, 256 }
 0x109   :  { %p238_p7 = scmp.ne.s32.totalorder %s329_s3, %s237_s15  ;;  %p241_p8 = scmp.lt.u32.totalorder %s237_s15, %s329_s3 }
 0x10b   :  { %p243_p9 = pnand %p241_p8, %p238_p7 }
 0x10d   :  { %246 = shalt.err (!%p243_p9)
}
 0x10e   :  { %151 = dma.vmem_to_hbm [thread:$0]  %s146_s12, 256, %s329_s3, [#allocation4], %s254_s22, %s254_s22, %s255_s23  }
 0x10f   :  { %251 = dma.done.wait [#allocation4], 256  }
 0x110   :  { %252 = vsyncadd [#allocation4], 4294967040 }
 0x111   :  { %155 = vsyncpa [#allocation3], 1 }
 0x112   :  { %156 = vsyncpa [#allocation6], 1 }
 0x113   :  { %157 = vsyncpa [#allocation4], 1 }

</bundles_post_ra>
